<compile_context>
chip_gen: v7x
topology: tpu7x:2x2x1
jax: 0.10.0
libtpu: 0.0.40
codegen_flags: <defaults>
</compile_context>

<pallas_src>
import jax
import jax.numpy as jnp
from jax.experimental import pallas as pl
from jax.experimental.pallas import tpu as pltpu

_LANE = 128
_SMALL_INPUT_ELEMS = 1 << 15      # below this, XLA fusion beats pallas_call overhead
_TARGET_BLOCK_BYTES = 2 << 20     # ~2 MiB blocks: near HBM roofline, VMEM-safe


def _relu_kernel(x_ref, o_ref):
    # Elementwise ReLU on the current VMEM tile (pure VPU work, fully
    # hidden behind the HBM<->VMEM DMA pipeline).
    o_ref[...] = jnp.maximum(x_ref[...], jnp.zeros((), dtype=x_ref.dtype))


def _pick_lane_width(n: int):
    """Largest lane-dense width (multiple of 128) that divides the element count."""
    for lanes in (4096, 2048, 1024, 512, 256, 128):
        if n % lanes == 0:
            return lanes
    return None


def rectified_linear(x: jax.Array, *, block_bytes: int = _TARGET_BLOCK_BYTES) -> jax.Array:
    """ReLU via a Pallas TPU kernel; shape/dtype agnostic (matches nn.ReLU)."""
    orig_shape = x.shape
    n = x.size
    if n == 0:
        return x

    lanes = _pick_lane_width(n)
    # Small or 128-indivisible inputs: plain XLA elementwise is strictly
    # faster than pallas_call fixed overhead / pad-and-slice copies.
    if lanes is None or n < _SMALL_INPUT_ELEMS:
        return jnp.maximum(x, jnp.zeros((), dtype=x.dtype))

    rows = n // lanes
    itemsize = jnp.dtype(x.dtype).itemsize
    sub = max(8, 32 // itemsize)          # sublane multiple: 8 f32, 16 bf16, 32 int8

    if rows <= sub:
        tile_r = rows                      # full row extent (always legal)
    else:
        target = max(1, block_bytes // (lanes * itemsize))
        tile_r = min(rows, target)
        tile_r = max(sub, (tile_r // sub) * sub)
        if tile_r >= rows:
            tile_r = rows

    grid = pl.cdiv(rows, tile_r)
    # v7x has 2 TensorCores sharing HBM: keep >=2 grid steps when there is
    # enough work so the "parallel" axis can shard across cores.
    if grid == 1 and rows >= 2 * sub:
        half = (rows + 1) // 2
        tile_r = ((half + sub - 1) // sub) * sub
        grid = pl.cdiv(rows, tile_r)

    x2 = x.reshape(rows, lanes)            # lane-dense slab: last dim multiple of 128

    out2 = pl.pallas_call(
        _relu_kernel,
        out_shape=jax.ShapeDtypeStruct((rows, lanes), x2.dtype),
        grid_spec=pltpu.PrefetchScalarGridSpec(
            num_scalar_prefetch=0,
            grid=(grid,),
            in_specs=[pl.BlockSpec((tile_r, lanes), lambda i: (i, 0))],
            out_specs=pl.BlockSpec((tile_r, lanes), lambda i: (i, 0)),
        ),
        compiler_params=pltpu.CompilerParams(
            dimension_semantics=("parallel",)),
    )(x2)
    return out2.reshape(orig_shape)


class RectifiedLinear:
    """JAX/Pallas port of farfield/fsmn.py::RectifiedLinear."""

    def __init__(self, input_dim: int, output_dim: int):
        # No learnable parameters; just records dim and applies ReLU.
        self.dim = input_dim

    def __call__(self, x: jax.Array) -> jax.Array:
        return rectified_linear(x)


if __name__ == "__main__":
    key = jax.random.PRNGKey(0)
    k0, k1, k2, k3 = jax.random.split(key, 4)

    # 1) Small module-sized input (B=2, T=8, D=32) -> small-input fallback path.
    B, T, D = 2, 8, 32
    x_small = jax.random.normal(k0, (B, T, D), dtype=jnp.float32)
    module = RectifiedLinear(D, D)
    out_small = jax.block_until_ready(module(x_small))
    assert out_small.shape == x_small.shape and out_small.dtype == x_small.dtype
    assert jnp.array_equal(out_small, jnp.maximum(x_small, 0.0))

    # 2) Medium f32 input -> Pallas path, lane-dense relayout (L=512),
    #    non-dividing row tile (cdiv grid with padded tail block).
    x_med = jax.random.normal(k1, (4, 300, 96), dtype=jnp.float32)
    out_med = jax.block_until_ready(rectified_linear(x_med))
    assert out_med.shape == x_med.shape and out_med.dtype == x_med.dtype
    assert jnp.array_equal(out_med, jnp.maximum(x_med, 0.0))

    # 3) bf16 input -> Pallas path with 16-row sublane packing.
    x_bf16 = jax.random.normal(k2, (2, 128, 256), dtype=jnp.bfloat16)
    out_bf16 = jax.block_until_ready(rectified_linear(x_bf16))
    assert out_bf16.shape == x_bf16.shape and out_bf16.dtype == x_bf16.dtype
    assert jnp.array_equal(out_bf16, jnp.maximum(x_bf16, jnp.bfloat16(0)))

    # 4) Size not a multiple of 128 -> clean fallback, still exact.
    x_odd = jax.random.normal(k3, (5, 77, 100), dtype=jnp.float32)
    out_odd = jax.block_until_ready(rectified_linear(x_odd))
    assert jnp.array_equal(out_odd, jnp.maximum(x_odd, 0.0))

    print("KERNEL_OK")
</pallas_src>

<mosaic_0001>
module attributes {stable_mosaic.version = 11 : i64} {
  func.func @_relu_kernel(%arg0: i32, %arg1: memref<224x512xf32, #tpu.memory_space<vmem>>, %arg2: memref<224x512xf32, #tpu.memory_space<vmem>>) attributes {dimension_semantics = [#tpu.dimension_semantics<parallel>], iteration_bounds = array<i64: 2>, scalar_prefetch = 0 : i64, scratch_operands = 0 : i64, tpu.core_type = #tpu.core_type<tc>, window_params = [{transform_indices = @transform_0, window_bounds = array<i64: 224, 512>}, {transform_indices = @transform_1, window_bounds = array<i64: 224, 512>}]} {
    %c0 = arith.constant 0 : index
    %c0_0 = arith.constant 0 : index
    %0 = vector.load %arg1[%c0, %c0_0] : memref<224x512xf32, #tpu.memory_space<vmem>>, vector<224x512xf32>
    %cst = arith.constant 0.000000e+00 : f32
    %1 = vector.broadcast %cst : f32 to vector<224x512xf32>
    %2 = arith.maximumf %0, %1 : vector<224x512xf32>
    %c0_1 = arith.constant 0 : index
    %c0_2 = arith.constant 0 : index
    %3 = vector.load %arg2[%c0_1, %c0_2] : memref<224x512xf32, #tpu.memory_space<vmem>>, vector<224x512xf32>
    tpu.vector_store %arg2[%c0_1, %c0_2], %2 {strides = array<i32>} : memref<224x512xf32, #tpu.memory_space<vmem>>, vector<224x512xf32>,
    return
  }
  func.func @transform_0(%arg0: i32) -> (i32, i32) {
    %c0_i32 = arith.constant 0 : i32
    %c0_i32_0 = arith.constant 0 : i32
    return %arg0, %c0_i32 : i32, i32
  }
  func.func @transform_1(%arg0: i32) -> (i32, i32) {
    %c0_i32 = arith.constant 0 : i32
    %c0_i32_0 = arith.constant 0 : i32
    return %arg0, %c0_i32 : i32, i32
  }
}

</mosaic_0001>

<bundles_post_ra>
// kernel: tpu_custom_call.1
= control target key start
LH: loop header
LB: loop body
LE: loop exit
PB: predicated region body
PF: predicated region fallthrough
CT: control target
= control target key end

     0   :  { %6 = vsyncpa [#allocation3], 0  ;;  %s1170_s0 = inlined_call_operand.hbm [shape: f32[225,512], index: 0, kind: input, shape index: {}]   ;;  %s1171_s1 = inlined_call_operand.hbm [shape: f32[225,512], index: 1, kind: output, shape index: {}]  }
   0x1   :  { %8 = vsyncpa [#allocation3 + $0x1], 0 }
   0x2   :  { %9 = vsyncpa [#allocation4], 0 }
   0x3   :  { %11 = vsyncpa [#allocation4 + $0x1], 0  ;;  %s771_s6 = smov 0   ;;  %s773_s7 = smov 0  }
   0x4   :  { %s775_s8 = smov 0   ;;  %s777_s9 = smov 0  }
   0x5 LB: > { %s792_s10 = sadd.s32 4294967295, %s753_s9   ;;  %s586_s11 = sadd.s32 4294967294, %s753_s9   ;;  %s753_s9 = sphi %s777_s9, %s1181_s9   ;;  %s749_s8 = sphi %s775_s8, %s1180_s8   ;;  %s745_s7 = sphi %s773_s7, %s1179_s7   ;;  %s741_s6 = sphi %s771_s6, %s1178_s6  }
   0x6   : > { %s796_s12 = sadd.s32 1, %s753_s9   ;;  %s24_s13 = sadd.s32 1, %s749_s8 }
   0x7   : > { %s21_s14 = ssub.s32 %s753_s9, %s796_s12  ;;  %p31_p0 = scmp.ne.s32.totalorder %s749_s8, %s745_s7 }
   0x8   : > { %p22_p1 = scmp.eq.s32.totalorder %s21_s14, 0  ;;  %p32_p2 = scmp.eq.s32.totalorder %s753_s9, 0 }
   0x9   : > { %p37_p3 = scmp.ne.s32.totalorder %s745_s7, %s741_s6  ;;  %p38_p4 = scmp.eq.s32.totalorder %s792_s10, 0 }
   0xa   : > { %s808_s15 = scalar_select %p22_p1, %s749_s8, %s24_s13  }
   0xb   : > { %p33_p5 = por %p32_p2, %p31_p0  ;;  %p810_p6 = por %p38_p4, %p37_p3 }
   0xc   : > { %p61_p7 = scmp.eq.s32.totalorder %s792_s10, 1  ;;  %p67_p8 = scmp.eq.s32.totalorder %s586_s11, 1 }
   0xd   : > { %p1172_p11 = scmp.ge.s32.totalorder %s753_s9, 2 }
   0xe   : > { %p815_p9 = por %p61_p7, %p31_p0  ;;  %p819_p10 = por %p67_p8, %p37_p3 }
   0xf   : > { %83 = sbr.rel (%p1172_p11) target bundleno = 57 (0x39), region = 16 }
  0x10   : > { %s1175_s18 = scalar_select %p819_p10, 1, 0 }
  0x16   : > { %86 = sbr.rel (!%p33_p5) target bundleno = 57 (0x39), region = 20  ;;  %s87_s19 = sand.u32 (%p33_p5), 1, %s749_s8  }
  0x17   : > { %s92_s20 = smul.u32 (%p33_p5), 28, %s753_s9  ;;  %s831_s25 = scalar_lea.sflag (%p33_p5), [#allocation3], %s87_s19 }
  0x18   : > { %s614_s21 = smul.u32 (%p33_p5), 896, %s87_s19 }
  0x19   : > { %s93_s22 = ssub.s32 (%p33_p5), 29, %s92_s20 }
  0x1a   : > { %p94_p12 = scmp.lt.s32.totalorder (%p33_p5), %s93_s22, 28  ;;  %s91_s26 = scalar_lea.vmem (%p33_p5), [#allocation2], %s614_s21 }
  0x1d   : > { %s1183_s22 = smov (!%p94_p12, %s93_s22), 28 }
  0x1e   : > { %s828_s23 = sshll.u32 %s1183_s22, 9 }
  0x1f   : > { %s99_s24 = ssub.s32 14336, %s828_s23 }
  0x20   : > { %100 = vsyncadd %s831_s25, %s99_s24  ;;  %p591_p13 = scmp.ne.s32.totalorder %s828_s23, 0  ;;  %s612_s27 = smul.u32 14336, %s753_s9 }
  0x21   : > { %s106_s28 = sshll.u32 %s91_s26, 4  ;;  %s663_s11 = scalar_lea.hbm %s1170_s0, 14848  ;;  %s841_s28 = int_to_ptr.vmem [resolvable:$true] %s106_s28 }
  0x22   : > { %s839_s2 = scalar_lea.hbm %s1170_s0, %s612_s27 }
  0x23   : > { %s659_s3 = scalar_lea.hbm %s839_s2, %s828_s23  ;;  %p664_p3 = scmp.lt.u32.totalorder %s839_s2, %s1170_s0 }
  0x24   : > { %p660_p0 = scmp.ne.s32.totalorder %s839_s2, %s659_s3  ;;  %p665_p4 = scmp.lt.u32.totalorder %s663_s11, %s659_s3 }
  0x25   : > { %p667_p7 = scmp.lt.u32.totalorder %s659_s3, %s839_s2 }
  0x26   : > { %p661_p1 = pnand %p660_p0, %p591_p13  ;;  %p666_p5 = por %p665_p4, %p664_p3 }
  0x28   : > { %p662_p2 = pneg %p661_p1  ;;  %p668_p8 = por %p667_p7, %p666_p5 }
  0x2a   : > { %p669_p12 = pnand %p668_p8, %p662_p2 }
  0x2c   : > { %672 = shalt.err (!%p669_p12)
}
  0x2d   : > { %s673_s19 = scalar_lea.vmem %s841_s28, %s828_s23  ;;  %s755_s20 = smov [#allocation2]  }
  0x2e   : > { %p674_p0 = scmp.ne.s32.totalorder %s841_s28, %s673_s19  ;;  %s677_s21 = sshll.u32 %s755_s20, 4  ;;  %s678_s21 = int_to_ptr.vmem [resolvable:$false] %s677_s21 }
  0x2f   : > { %s679_s22 = scalar_lea.vmem %s678_s21, 28672  ;;  %p680_p10 = scmp.lt.s32.totalorder %s841_s28, %s678_s21 }
  0x30   : > { %p675_p1 = pnand %p674_p0, %p591_p13  ;;  %p681_p3 = scmp.lt.s32.totalorder %s679_s22, %s673_s19 }
  0x32   : > { %p676_p11 = pneg %p675_p1  ;;  %p682_p4 = por %p681_p3, %p680_p10 }
  0x34   : > { %p683_p5 = pnand %p682_p4, %p676_p11 }
  0x36   : > { %686 = shalt.err (!%p683_p5)
}
  0x37   : > { %s756_s24 = smov 512   ;;  %s757_s26 = smov 32  }
  0x38   : > { %112 = dma.hbm_to_vmem [thread:$0]  (%p591_p13), %s839_s2, %s828_s23, %s841_s28, %s831_s25, %s756_s24, %s756_s24, %s757_s26  }
  0x39 PF: > { %p596_p2 = scmp.ge.s32.totalorder %s753_s9, 1  ;;  %p114_p7 = scmp.lt.s32.totalorder %s753_s9, 3 }
  0x3b   : > { %p115_p8 = pnand %p596_p2, %p114_p7 }
  0x3c   : > { %s871_s27 = sand.u32 (!%p115_p8), 1, %s745_s7  }
  0x3d   : > { %118 = sbr.rel (%p115_p8) target bundleno = 159 (0x9f), region = 24  ;;  %s121_s30 = scalar_lea.sflag (!%p115_p8), [#allocation3], %s871_s27 }
  0x3e   : > { %s615_s29 = smul.u32 (!%p115_p8), 896, %s871_s27 }
  0x40   : > { %s875_s3 = scalar_lea.vmem (!%p115_p8), [#allocation2], %s615_s29 }
  0x44   : > { %732 = dma.done.wait (%p810_p6), %s121_s30, 14336  }
  0x45   : > { %734 = vsyncadd (%p810_p6), %s121_s30, 4294952960  ;;  %v155_v0 = vld [vmem:[%s875_s3] sm:$0xff]  ;;  %v156_v1 = vld [vmem:[%s875_s3 + $0x8] sm:$0xff]  ;;  %s890_s16 = scalar_lea.vmem [#allocation5], %s615_s29  ;;  %s492_s23 = scalar_lea.sflag [#allocation4], %s871_s27 }
  0x46   : > { %v157_v2 = vld [vmem:[%s875_s3 + $0x10] sm:$0xff]  ;;  %v267_v3 = vmax.f32 %v155_v0, 0.0  ;;  %v268_v4 = vmax.f32 %v156_v1, 0.0  ;;  %v158_v6 = vld [vmem:[%s875_s3 + $0x18] sm:$0xff]  ;;  %v159_v7 = vld [vmem:[%s875_s3 + $0x20] sm:$0xff]  ;;  %s499_s25 = smul.u32 (%p815_p9), 28, %s792_s10 }
  0x47   : > { %v269_v5 = vmax.f32 %v157_v2, 0.0  ;;  %v160_v8 = vld [vmem:[%s875_s3 + $0x28] sm:$0xff]  ;;  %v270_v9 = vmax.f32 %v158_v6, 0.0  ;;  %v271_v10 = vmax.f32 %v159_v7, 0.0  ;;  %v161_v12 = vld [vmem:[%s875_s3 + $0x30] sm:$0xff]  ;;  %v162_v13 = vld [vmem:[%s875_s3 + $0x38] sm:$0xff] }
  0x48   : > { %v272_v11 = vmax.f32 %v160_v8, 0.0  ;;  %v163_v14 = vld [vmem:[%s875_s3 + $0x40] sm:$0xff]  ;;  %379 = vst [vmem:[%s890_s16] sm:$0xff] %v267_v3  ;;  %380 = vst [vmem:[%s890_s16 + $0x8] sm:$0xff] %v268_v4  ;;  %v273_v15 = vmax.f32 %v161_v12, 0.0  ;;  %v274_v16 = vmax.f32 %v162_v13, 0.0  ;;  %v164_v18 = vld [vmem:[%s875_s3 + $0x48] sm:$0xff] }
  0x49   : > { %381 = vst [vmem:[%s890_s16 + $0x10] sm:$0xff] %v269_v5  ;;  %v275_v17 = vmax.f32 %v163_v14, 0.0  ;;  %v165_v19 = vld [vmem:[%s875_s3 + $0x50] sm:$0xff]  ;;  %v166_v20 = vld [vmem:[%s875_s3 + $0x58] sm:$0xff]  ;;  %382 = vst [vmem:[%s890_s16 + $0x18] sm:$0xff] %v270_v9  ;;  %v276_v21 = vmax.f32 %v164_v18, 0.0 }
  0x4a   : > { %383 = vst [vmem:[%s890_s16 + $0x20] sm:$0xff] %v271_v10  ;;  %384 = vst [vmem:[%s890_s16 + $0x28] sm:$0xff] %v272_v11  ;;  %v277_v22 = vmax.f32 %v165_v19, 0.0  ;;  %v278_v23 = vmax.f32 %v166_v20, 0.0  ;;  %v167_v24 = vld [vmem:[%s875_s3 + $0x60] sm:$0xff]  ;;  %v168_v25 = vld [vmem:[%s875_s3 + $0x68] sm:$0xff] }
  0x4b   : > { %v169_v26 = vld [vmem:[%s875_s3 + $0x70] sm:$0xff]  ;;  %385 = vst [vmem:[%s890_s16 + $0x30] sm:$0xff] %v273_v15  ;;  %386 = vst [vmem:[%s890_s16 + $0x38] sm:$0xff] %v274_v16  ;;  %v279_v27 = vmax.f32 %v167_v24, 0.0  ;;  %v280_v28 = vmax.f32 %v168_v25, 0.0  ;;  %v170_v30 = vld [vmem:[%s875_s3 + $0x78] sm:$0xff] }
  0x4c   : > { %387 = vst [vmem:[%s890_s16 + $0x40] sm:$0xff] %v275_v17  ;;  %v281_v29 = vmax.f32 %v169_v26, 0.0  ;;  %v171_v31 = vld [vmem:[%s875_s3 + $0x80] sm:$0xff]  ;;  %v172_v32 = vld [vmem:[%s875_s3 + $0x88] sm:$0xff]  ;;  %388 = vst [vmem:[%s890_s16 + $0x48] sm:$0xff] %v276_v21  ;;  %v282_v33 = vmax.f32 %v170_v30, 0.0 }
  0x4d   : > { %389 = vst [vmem:[%s890_s16 + $0x50] sm:$0xff] %v277_v22  ;;  %390 = vst [vmem:[%s890_s16 + $0x58] sm:$0xff] %v278_v23  ;;  %v283_v34 = vmax.f32 %v171_v31, 0.0  ;;  %v284_v35 = vmax.f32 %v172_v32, 0.0  ;;  %v173_v36 = vld [vmem:[%s875_s3 + $0x90] sm:$0xff]  ;;  %v174_v37 = vld [vmem:[%s875_s3 + $0x98] sm:$0xff] }
  0x4e   : > { %v175_v38 = vld [vmem:[%s875_s3 + $0xa0] sm:$0xff]  ;;  %391 = vst [vmem:[%s890_s16 + $0x60] sm:$0xff] %v279_v27  ;;  %392 = vst [vmem:[%s890_s16 + $0x68] sm:$0xff] %v280_v28  ;;  %v285_v39 = vmax.f32 %v173_v36, 0.0  ;;  %v286_v40 = vmax.f32 %v174_v37, 0.0  ;;  %v176_v42 = vld [vmem:[%s875_s3 + $0xa8] sm:$0xff] }
  0x4f   : > { %393 = vst [vmem:[%s890_s16 + $0x70] sm:$0xff] %v281_v29  ;;  %v287_v41 = vmax.f32 %v175_v38, 0.0  ;;  %v177_v43 = vld [vmem:[%s875_s3 + $0xb0] sm:$0xff]  ;;  %v178_v44 = vld [vmem:[%s875_s3 + $0xb8] sm:$0xff]  ;;  %394 = vst [vmem:[%s890_s16 + $0x78] sm:$0xff] %v282_v33  ;;  %v288_v45 = vmax.f32 %v176_v42, 0.0 }
  0x50   : > { %395 = vst [vmem:[%s890_s16 + $0x80] sm:$0xff] %v283_v34  ;;  %396 = vst [vmem:[%s890_s16 + $0x88] sm:$0xff] %v284_v35  ;;  %v289_v46 = vmax.f32 %v177_v43, 0.0  ;;  %v290_v47 = vmax.f32 %v178_v44, 0.0  ;;  %v179_v48 = vld [vmem:[%s875_s3 + $0xc0] sm:$0xff]  ;;  %v180_v49 = vld [vmem:[%s875_s3 + $0xc8] sm:$0xff] }
  0x51   : > { %v181_v50 = vld [vmem:[%s875_s3 + $0xd0] sm:$0xff]  ;;  %397 = vst [vmem:[%s890_s16 + $0x90] sm:$0xff] %v285_v39  ;;  %398 = vst [vmem:[%s890_s16 + $0x98] sm:$0xff] %v286_v40  ;;  %v291_v51 = vmax.f32 %v179_v48, 0.0  ;;  %v292_v52 = vmax.f32 %v180_v49, 0.0  ;;  %v182_v54 = vld [vmem:[%s875_s3 + $0xd8] sm:$0xff] }
  0x52   : > { %399 = vst [vmem:[%s890_s16 + $0xa0] sm:$0xff] %v287_v41  ;;  %v293_v53 = vmax.f32 %v181_v50, 0.0  ;;  %v183_v55 = vld [vmem:[%s875_s3 + $0xe0] sm:$0xff]  ;;  %v184_v56 = vld [vmem:[%s875_s3 + $0xe8] sm:$0xff]  ;;  %400 = vst [vmem:[%s890_s16 + $0xa8] sm:$0xff] %v288_v45  ;;  %v294_v57 = vmax.f32 %v182_v54, 0.0 }
  0x53   : > { %401 = vst [vmem:[%s890_s16 + $0xb0] sm:$0xff] %v289_v46  ;;  %402 = vst [vmem:[%s890_s16 + $0xb8] sm:$0xff] %v290_v47  ;;  %v295_v58 = vmax.f32 %v183_v55, 0.0  ;;  %v296_v59 = vmax.f32 %v184_v56, 0.0  ;;  %v185_v60 = vld [vmem:[%s875_s3 + $0xf0] sm:$0xff]  ;;  %v186_v61 = vld [vmem:[%s875_s3 + $0xf8] sm:$0xff] }
  0x54   : > { %v187_v62 = vld [vmem:[%s875_s3 + $0x100] sm:$0xff]  ;;  %403 = vst [vmem:[%s890_s16 + $0xc0] sm:$0xff] %v291_v51  ;;  %404 = vst [vmem:[%s890_s16 + $0xc8] sm:$0xff] %v292_v52  ;;  %v297_v63 = vmax.f32 %v185_v60, 0.0  ;;  %v298_v0 = vmax.f32 %v186_v61, 0.0  ;;  %v188_v2 = vld [vmem:[%s875_s3 + $0x108] sm:$0xff] }
  0x55   : > { %405 = vst [vmem:[%s890_s16 + $0xd0] sm:$0xff] %v293_v53  ;;  %v299_v1 = vmax.f32 %v187_v62, 0.0  ;;  %v189_v3 = vld [vmem:[%s875_s3 + $0x110] sm:$0xff]  ;;  %v190_v4 = vld [vmem:[%s875_s3 + $0x118] sm:$0xff]  ;;  %406 = vst [vmem:[%s890_s16 + $0xd8] sm:$0xff] %v294_v57  ;;  %v300_v5 = vmax.f32 %v188_v2, 0.0 }
  0x56   : > { %407 = vst [vmem:[%s890_s16 + $0xe0] sm:$0xff] %v295_v58  ;;  %408 = vst [vmem:[%s890_s16 + $0xe8] sm:$0xff] %v296_v59  ;;  %v301_v6 = vmax.f32 %v189_v3, 0.0  ;;  %v302_v7 = vmax.f32 %v190_v4, 0.0  ;;  %v191_v8 = vld [vmem:[%s875_s3 + $0x120] sm:$0xff]  ;;  %v192_v9 = vld [vmem:[%s875_s3 + $0x128] sm:$0xff] }
  0x57   : > { %v193_v10 = vld [vmem:[%s875_s3 + $0x130] sm:$0xff]  ;;  %409 = vst [vmem:[%s890_s16 + $0xf0] sm:$0xff] %v297_v63  ;;  %410 = vst [vmem:[%s890_s16 + $0xf8] sm:$0xff] %v298_v0  ;;  %v303_v11 = vmax.f32 %v191_v8, 0.0  ;;  %v304_v12 = vmax.f32 %v192_v9, 0.0  ;;  %v194_v14 = vld [vmem:[%s875_s3 + $0x138] sm:$0xff] }
  0x58   : > { %411 = vst [vmem:[%s890_s16 + $0x100] sm:$0xff] %v299_v1  ;;  %v305_v13 = vmax.f32 %v193_v10, 0.0  ;;  %v195_v15 = vld [vmem:[%s875_s3 + $0x140] sm:$0xff]  ;;  %v196_v16 = vld [vmem:[%s875_s3 + $0x148] sm:$0xff]  ;;  %412 = vst [vmem:[%s890_s16 + $0x108] sm:$0xff] %v300_v5  ;;  %v306_v17 = vmax.f32 %v194_v14, 0.0 }
  0x59   : > { %413 = vst [vmem:[%s890_s16 + $0x110] sm:$0xff] %v301_v6  ;;  %414 = vst [vmem:[%s890_s16 + $0x118] sm:$0xff] %v302_v7  ;;  %v307_v18 = vmax.f32 %v195_v15, 0.0  ;;  %v308_v19 = vmax.f32 %v196_v16, 0.0  ;;  %v197_v20 = vld [vmem:[%s875_s3 + $0x150] sm:$0xff]  ;;  %v198_v21 = vld [vmem:[%s875_s3 + $0x158] sm:$0xff] }
  0x5a   : > { %v199_v22 = vld [vmem:[%s875_s3 + $0x160] sm:$0xff]  ;;  %415 = vst [vmem:[%s890_s16 + $0x120] sm:$0xff] %v303_v11  ;;  %416 = vst [vmem:[%s890_s16 + $0x128] sm:$0xff] %v304_v12  ;;  %v309_v23 = vmax.f32 %v197_v20, 0.0  ;;  %v310_v24 = vmax.f32 %v198_v21, 0.0  ;;  %v200_v26 = vld [vmem:[%s875_s3 + $0x168] sm:$0xff] }
  0x5b   : > { %417 = vst [vmem:[%s890_s16 + $0x130] sm:$0xff] %v305_v13  ;;  %v311_v25 = vmax.f32 %v199_v22, 0.0  ;;  %v201_v27 = vld [vmem:[%s875_s3 + $0x170] sm:$0xff]  ;;  %v202_v28 = vld [vmem:[%s875_s3 + $0x178] sm:$0xff]  ;;  %418 = vst [vmem:[%s890_s16 + $0x138] sm:$0xff] %v306_v17  ;;  %v312_v29 = vmax.f32 %v200_v26, 0.0 }
  0x5c   : > { %419 = vst [vmem:[%s890_s16 + $0x140] sm:$0xff] %v307_v18  ;;  %420 = vst [vmem:[%s890_s16 + $0x148] sm:$0xff] %v308_v19  ;;  %v313_v30 = vmax.f32 %v201_v27, 0.0  ;;  %v314_v31 = vmax.f32 %v202_v28, 0.0  ;;  %v203_v32 = vld [vmem:[%s875_s3 + $0x180] sm:$0xff]  ;;  %v204_v33 = vld [vmem:[%s875_s3 + $0x188] sm:$0xff] }
  0x5d   : > { %v205_v34 = vld [vmem:[%s875_s3 + $0x190] sm:$0xff]  ;;  %421 = vst [vmem:[%s890_s16 + $0x150] sm:$0xff] %v309_v23  ;;  %422 = vst [vmem:[%s890_s16 + $0x158] sm:$0xff] %v310_v24  ;;  %v315_v35 = vmax.f32 %v203_v32, 0.0  ;;  %v316_v36 = vmax.f32 %v204_v33, 0.0  ;;  %v206_v38 = vld [vmem:[%s875_s3 + $0x198] sm:$0xff] }
  0x5e   : > { %423 = vst [vmem:[%s890_s16 + $0x160] sm:$0xff] %v311_v25  ;;  %v317_v37 = vmax.f32 %v205_v34, 0.0  ;;  %v207_v39 = vld [vmem:[%s875_s3 + $0x1a0] sm:$0xff]  ;;  %v208_v40 = vld [vmem:[%s875_s3 + $0x1a8] sm:$0xff]  ;;  %424 = vst [vmem:[%s890_s16 + $0x168] sm:$0xff] %v312_v29  ;;  %v318_v41 = vmax.f32 %v206_v38, 0.0 }
  0x5f   : > { %425 = vst [vmem:[%s890_s16 + $0x170] sm:$0xff] %v313_v30  ;;  %426 = vst [vmem:[%s890_s16 + $0x178] sm:$0xff] %v314_v31  ;;  %v319_v42 = vmax.f32 %v207_v39, 0.0  ;;  %v320_v43 = vmax.f32 %v208_v40, 0.0  ;;  %v209_v44 = vld [vmem:[%s875_s3 + $0x1b0] sm:$0xff]  ;;  %v210_v45 = vld [vmem:[%s875_s3 + $0x1b8] sm:$0xff] }
  0x60   : > { %v211_v46 = vld [vmem:[%s875_s3 + $0x1c0] sm:$0xff]  ;;  %427 = vst [vmem:[%s890_s16 + $0x180] sm:$0xff] %v315_v35  ;;  %428 = vst [vmem:[%s890_s16 + $0x188] sm:$0xff] %v316_v36  ;;  %v321_v47 = vmax.f32 %v209_v44, 0.0  ;;  %v322_v48 = vmax.f32 %v210_v45, 0.0  ;;  %v212_v50 = vld [vmem:[%s875_s3 + $0x1c8] sm:$0xff] }
  0x61   : > { %429 = vst [vmem:[%s890_s16 + $0x190] sm:$0xff] %v317_v37  ;;  %v323_v49 = vmax.f32 %v211_v46, 0.0  ;;  %v213_v51 = vld [vmem:[%s875_s3 + $0x1d0] sm:$0xff]  ;;  %v214_v52 = vld [vmem:[%s875_s3 + $0x1d8] sm:$0xff]  ;;  %430 = vst [vmem:[%s890_s16 + $0x198] sm:$0xff] %v318_v41  ;;  %v324_v53 = vmax.f32 %v212_v50, 0.0 }
  0x62   : > { %431 = vst [vmem:[%s890_s16 + $0x1a0] sm:$0xff] %v319_v42  ;;  %432 = vst [vmem:[%s890_s16 + $0x1a8] sm:$0xff] %v320_v43  ;;  %v325_v54 = vmax.f32 %v213_v51, 0.0  ;;  %v326_v55 = vmax.f32 %v214_v52, 0.0  ;;  %v215_v56 = vld [vmem:[%s875_s3 + $0x1e0] sm:$0xff]  ;;  %v216_v57 = vld [vmem:[%s875_s3 + $0x1e8] sm:$0xff] }
  0x63   : > { %v217_v58 = vld [vmem:[%s875_s3 + $0x1f0] sm:$0xff]  ;;  %433 = vst [vmem:[%s890_s16 + $0x1b0] sm:$0xff] %v321_v47  ;;  %434 = vst [vmem:[%s890_s16 + $0x1b8] sm:$0xff] %v322_v48  ;;  %v327_v59 = vmax.f32 %v215_v56, 0.0  ;;  %v328_v60 = vmax.f32 %v216_v57, 0.0  ;;  %v218_v62 = vld [vmem:[%s875_s3 + $0x1f8] sm:$0xff] }
  0x64   : > { %435 = vst [vmem:[%s890_s16 + $0x1c0] sm:$0xff] %v323_v49  ;;  %v329_v61 = vmax.f32 %v217_v58, 0.0  ;;  %v219_v63 = vld [vmem:[%s875_s3 + $0x200] sm:$0xff]  ;;  %v220_v0 = vld [vmem:[%s875_s3 + $0x208] sm:$0xff]  ;;  %436 = vst [vmem:[%s890_s16 + $0x1c8] sm:$0xff] %v324_v53  ;;  %v330_v1 = vmax.f32 %v218_v62, 0.0 }
  0x65   : > { %437 = vst [vmem:[%s890_s16 + $0x1d0] sm:$0xff] %v325_v54  ;;  %438 = vst [vmem:[%s890_s16 + $0x1d8] sm:$0xff] %v326_v55  ;;  %v331_v2 = vmax.f32 %v219_v63, 0.0  ;;  %v332_v3 = vmax.f32 %v220_v0, 0.0  ;;  %v221_v4 = vld [vmem:[%s875_s3 + $0x210] sm:$0xff]  ;;  %v222_v5 = vld [vmem:[%s875_s3 + $0x218] sm:$0xff] }
  0x66   : > { %v223_v6 = vld [vmem:[%s875_s3 + $0x220] sm:$0xff]  ;;  %439 = vst [vmem:[%s890_s16 + $0x1e0] sm:$0xff] %v327_v59  ;;  %440 = vst [vmem:[%s890_s16 + $0x1e8] sm:$0xff] %v328_v60  ;;  %v333_v7 = vmax.f32 %v221_v4, 0.0  ;;  %v334_v8 = vmax.f32 %v222_v5, 0.0  ;;  %v224_v10 = vld [vmem:[%s875_s3 + $0x228] sm:$0xff] }
  0x67   : > { %441 = vst [vmem:[%s890_s16 + $0x1f0] sm:$0xff] %v329_v61  ;;  %v335_v9 = vmax.f32 %v223_v6, 0.0  ;;  %v225_v11 = vld [vmem:[%s875_s3 + $0x230] sm:$0xff]  ;;  %v226_v12 = vld [vmem:[%s875_s3 + $0x238] sm:$0xff]  ;;  %442 = vst [vmem:[%s890_s16 + $0x1f8] sm:$0xff] %v330_v1  ;;  %v336_v13 = vmax.f32 %v224_v10, 0.0 }
  0x68   : > { %443 = vst [vmem:[%s890_s16 + $0x200] sm:$0xff] %v331_v2  ;;  %444 = vst [vmem:[%s890_s16 + $0x208] sm:$0xff] %v332_v3  ;;  %v337_v14 = vmax.f32 %v225_v11, 0.0  ;;  %v338_v15 = vmax.f32 %v226_v12, 0.0  ;;  %v227_v16 = vld [vmem:[%s875_s3 + $0x240] sm:$0xff]  ;;  %v228_v17 = vld [vmem:[%s875_s3 + $0x248] sm:$0xff] }
  0x69   : > { %v229_v18 = vld [vmem:[%s875_s3 + $0x250] sm:$0xff]  ;;  %445 = vst [vmem:[%s890_s16 + $0x210] sm:$0xff] %v333_v7  ;;  %446 = vst [vmem:[%s890_s16 + $0x218] sm:$0xff] %v334_v8  ;;  %v339_v19 = vmax.f32 %v227_v16, 0.0  ;;  %v340_v20 = vmax.f32 %v228_v17, 0.0  ;;  %v230_v22 = vld [vmem:[%s875_s3 + $0x258] sm:$0xff] }
  0x6a   : > { %447 = vst [vmem:[%s890_s16 + $0x220] sm:$0xff] %v335_v9  ;;  %v341_v21 = vmax.f32 %v229_v18, 0.0  ;;  %v231_v23 = vld [vmem:[%s875_s3 + $0x260] sm:$0xff]  ;;  %v232_v24 = vld [vmem:[%s875_s3 + $0x268] sm:$0xff]  ;;  %448 = vst [vmem:[%s890_s16 + $0x228] sm:$0xff] %v336_v13  ;;  %v342_v25 = vmax.f32 %v230_v22, 0.0 }
  0x6b   : > { %449 = vst [vmem:[%s890_s16 + $0x230] sm:$0xff] %v337_v14  ;;  %450 = vst [vmem:[%s890_s16 + $0x238] sm:$0xff] %v338_v15  ;;  %v343_v26 = vmax.f32 %v231_v23, 0.0  ;;  %v344_v27 = vmax.f32 %v232_v24, 0.0  ;;  %v233_v28 = vld [vmem:[%s875_s3 + $0x270] sm:$0xff]  ;;  %v234_v29 = vld [vmem:[%s875_s3 + $0x278] sm:$0xff] }
  0x6c   : > { %v235_v30 = vld [vmem:[%s875_s3 + $0x280] sm:$0xff]  ;;  %451 = vst [vmem:[%s890_s16 + $0x240] sm:$0xff] %v339_v19  ;;  %452 = vst [vmem:[%s890_s16 + $0x248] sm:$0xff] %v340_v20  ;;  %v345_v31 = vmax.f32 %v233_v28, 0.0  ;;  %v346_v32 = vmax.f32 %v234_v29, 0.0  ;;  %v236_v34 = vld [vmem:[%s875_s3 + $0x288] sm:$0xff] }
  0x6d   : > { %453 = vst [vmem:[%s890_s16 + $0x250] sm:$0xff] %v341_v21  ;;  %v347_v33 = vmax.f32 %v235_v30, 0.0  ;;  %v237_v35 = vld [vmem:[%s875_s3 + $0x290] sm:$0xff]  ;;  %v238_v36 = vld [vmem:[%s875_s3 + $0x298] sm:$0xff]  ;;  %454 = vst [vmem:[%s890_s16 + $0x258] sm:$0xff] %v342_v25  ;;  %v348_v37 = vmax.f32 %v236_v34, 0.0 }
  0x6e   : > { %455 = vst [vmem:[%s890_s16 + $0x260] sm:$0xff] %v343_v26  ;;  %456 = vst [vmem:[%s890_s16 + $0x268] sm:$0xff] %v344_v27  ;;  %v349_v38 = vmax.f32 %v237_v35, 0.0  ;;  %v350_v39 = vmax.f32 %v238_v36, 0.0  ;;  %v239_v40 = vld [vmem:[%s875_s3 + $0x2a0] sm:$0xff]  ;;  %v240_v41 = vld [vmem:[%s875_s3 + $0x2a8] sm:$0xff] }
  0x6f   : > { %v241_v42 = vld [vmem:[%s875_s3 + $0x2b0] sm:$0xff]  ;;  %457 = vst [vmem:[%s890_s16 + $0x270] sm:$0xff] %v345_v31  ;;  %458 = vst [vmem:[%s890_s16 + $0x278] sm:$0xff] %v346_v32  ;;  %v351_v43 = vmax.f32 %v239_v40, 0.0  ;;  %v352_v44 = vmax.f32 %v240_v41, 0.0  ;;  %v242_v46 = vld [vmem:[%s875_s3 + $0x2b8] sm:$0xff] }
  0x70   : > { %459 = vst [vmem:[%s890_s16 + $0x280] sm:$0xff] %v347_v33  ;;  %v353_v45 = vmax.f32 %v241_v42, 0.0  ;;  %v243_v47 = vld [vmem:[%s875_s3 + $0x2c0] sm:$0xff]  ;;  %v244_v48 = vld [vmem:[%s875_s3 + $0x2c8] sm:$0xff]  ;;  %460 = vst [vmem:[%s890_s16 + $0x288] sm:$0xff] %v348_v37  ;;  %v354_v49 = vmax.f32 %v242_v46, 0.0 }
  0x71   : > { %461 = vst [vmem:[%s890_s16 + $0x290] sm:$0xff] %v349_v38  ;;  %462 = vst [vmem:[%s890_s16 + $0x298] sm:$0xff] %v350_v39  ;;  %v355_v50 = vmax.f32 %v243_v47, 0.0  ;;  %v356_v51 = vmax.f32 %v244_v48, 0.0  ;;  %v245_v52 = vld [vmem:[%s875_s3 + $0x2d0] sm:$0xff]  ;;  %v246_v53 = vld [vmem:[%s875_s3 + $0x2d8] sm:$0xff] }
  0x72   : > { %v247_v54 = vld [vmem:[%s875_s3 + $0x2e0] sm:$0xff]  ;;  %463 = vst [vmem:[%s890_s16 + $0x2a0] sm:$0xff] %v351_v43  ;;  %464 = vst [vmem:[%s890_s16 + $0x2a8] sm:$0xff] %v352_v44  ;;  %v357_v55 = vmax.f32 %v245_v52, 0.0  ;;  %v358_v56 = vmax.f32 %v246_v53, 0.0  ;;  %v248_v58 = vld [vmem:[%s875_s3 + $0x2e8] sm:$0xff] }
  0x73   : > { %465 = vst [vmem:[%s890_s16 + $0x2b0] sm:$0xff] %v353_v45  ;;  %v359_v57 = vmax.f32 %v247_v54, 0.0  ;;  %v249_v59 = vld [vmem:[%s875_s3 + $0x2f0] sm:$0xff]  ;;  %v250_v60 = vld [vmem:[%s875_s3 + $0x2f8] sm:$0xff]  ;;  %466 = vst [vmem:[%s890_s16 + $0x2b8] sm:$0xff] %v354_v49  ;;  %v360_v61 = vmax.f32 %v248_v58, 0.0 }
  0x74   : > { %467 = vst [vmem:[%s890_s16 + $0x2c0] sm:$0xff] %v355_v50  ;;  %468 = vst [vmem:[%s890_s16 + $0x2c8] sm:$0xff] %v356_v51  ;;  %v361_v62 = vmax.f32 %v249_v59, 0.0  ;;  %v362_v63 = vmax.f32 %v250_v60, 0.0  ;;  %v251_v0 = vld [vmem:[%s875_s3 + $0x300] sm:$0xff]  ;;  %v252_v1 = vld [vmem:[%s875_s3 + $0x308] sm:$0xff] }
  0x75   : > { %v253_v2 = vld [vmem:[%s875_s3 + $0x310] sm:$0xff]  ;;  %469 = vst [vmem:[%s890_s16 + $0x2d0] sm:$0xff] %v357_v55  ;;  %470 = vst [vmem:[%s890_s16 + $0x2d8] sm:$0xff] %v358_v56  ;;  %v363_v3 = vmax.f32 %v251_v0, 0.0  ;;  %v364_v4 = vmax.f32 %v252_v1, 0.0  ;;  %v254_v6 = vld [vmem:[%s875_s3 + $0x318] sm:$0xff] }
  0x76   : > { %471 = vst [vmem:[%s890_s16 + $0x2e0] sm:$0xff] %v359_v57  ;;  %v365_v5 = vmax.f32 %v253_v2, 0.0  ;;  %v255_v7 = vld [vmem:[%s875_s3 + $0x320] sm:$0xff]  ;;  %v256_v8 = vld [vmem:[%s875_s3 + $0x328] sm:$0xff]  ;;  %472 = vst [vmem:[%s890_s16 + $0x2e8] sm:$0xff] %v360_v61  ;;  %v366_v9 = vmax.f32 %v254_v6, 0.0 }
  0x77   : > { %473 = vst [vmem:[%s890_s16 + $0x2f0] sm:$0xff] %v361_v62  ;;  %474 = vst [vmem:[%s890_s16 + $0x2f8] sm:$0xff] %v362_v63  ;;  %v367_v10 = vmax.f32 %v255_v7, 0.0  ;;  %v368_v11 = vmax.f32 %v256_v8, 0.0  ;;  %v257_v12 = vld [vmem:[%s875_s3 + $0x330] sm:$0xff]  ;;  %v258_v13 = vld [vmem:[%s875_s3 + $0x338] sm:$0xff] }
  0x78   : > { %v259_v14 = vld [vmem:[%s875_s3 + $0x340] sm:$0xff]  ;;  %475 = vst [vmem:[%s890_s16 + $0x300] sm:$0xff] %v363_v3  ;;  %476 = vst [vmem:[%s890_s16 + $0x308] sm:$0xff] %v364_v4  ;;  %v369_v15 = vmax.f32 %v257_v12, 0.0  ;;  %v370_v16 = vmax.f32 %v258_v13, 0.0  ;;  %v260_v18 = vld [vmem:[%s875_s3 + $0x348] sm:$0xff] }
  0x79   : > { %477 = vst [vmem:[%s890_s16 + $0x310] sm:$0xff] %v365_v5  ;;  %v371_v17 = vmax.f32 %v259_v14, 0.0  ;;  %v261_v19 = vld [vmem:[%s875_s3 + $0x350] sm:$0xff]  ;;  %v262_v20 = vld [vmem:[%s875_s3 + $0x358] sm:$0xff]  ;;  %478 = vst [vmem:[%s890_s16 + $0x318] sm:$0xff] %v366_v9  ;;  %v372_v21 = vmax.f32 %v260_v18, 0.0 }
  0x7a   : > { %479 = vst [vmem:[%s890_s16 + $0x320] sm:$0xff] %v367_v10  ;;  %480 = vst [vmem:[%s890_s16 + $0x328] sm:$0xff] %v368_v11  ;;  %v373_v22 = vmax.f32 %v261_v19, 0.0  ;;  %v374_v23 = vmax.f32 %v262_v20, 0.0  ;;  %v263_v24 = vld [vmem:[%s875_s3 + $0x360] sm:$0xff]  ;;  %v264_v25 = vld [vmem:[%s875_s3 + $0x368] sm:$0xff] }
  0x7b   : > { %v265_v26 = vld [vmem:[%s875_s3 + $0x370] sm:$0xff]  ;;  %481 = vst [vmem:[%s890_s16 + $0x330] sm:$0xff] %v369_v15  ;;  %482 = vst [vmem:[%s890_s16 + $0x338] sm:$0xff] %v370_v16  ;;  %v375_v27 = vmax.f32 %v263_v24, 0.0  ;;  %v376_v28 = vmax.f32 %v264_v25, 0.0  ;;  %v266_v30 = vld [vmem:[%s875_s3 + $0x378] sm:$0xff] }
  0x7c   : > { %483 = vst [vmem:[%s890_s16 + $0x340] sm:$0xff] %v371_v17  ;;  %v377_v29 = vmax.f32 %v265_v26, 0.0  ;;  %484 = vst [vmem:[%s890_s16 + $0x348] sm:$0xff] %v372_v21  ;;  %v378_v31 = vmax.f32 %v266_v30, 0.0  ;;  %498 = sbr.rel (!%p815_p9) target bundleno = 159 (0x9f), region = 32  ;;  %s500_s28 = ssub.s32 (%p815_p9), 29, %s499_s25 }
  0x7d   : > { %485 = vst [vmem:[%s890_s16 + $0x350] sm:$0xff] %v373_v22  ;;  %486 = vst [vmem:[%s890_s16 + $0x358] sm:$0xff] %v374_v23  ;;  %p501_p6 = scmp.lt.s32.totalorder (%p815_p9), %s500_s28, 28 }
  0x7e   : > { %487 = vst [vmem:[%s890_s16 + $0x360] sm:$0xff] %v375_v27  ;;  %488 = vst [vmem:[%s890_s16 + $0x368] sm:$0xff] %v376_v28 }
  0x7f   : > { %489 = vst [vmem:[%s890_s16 + $0x370] sm:$0xff] %v377_v29  ;;  %490 = vst [vmem:[%s890_s16 + $0x378] sm:$0xff] %v378_v31 }
  0x83   : > { %s1185_s28 = smov (!%p501_p6, %s500_s28), 28 }
  0x84   : > { %s1111_s2 = sshll.u32 %s1185_s28, 9 }
  0x85   : > { %s506_s4 = ssub.s32 14336, %s1111_s2 }
  0x86   : > { %507 = vsyncadd %s492_s23, %s506_s4  ;;  %p599_p10 = scmp.ne.s32.totalorder %s1111_s2, 0  ;;  %s613_s17 = smul.u32 14336, %s792_s10 }
  0x87   : > { %s513_s5 = sshll.u32 %s890_s16, 4  ;;  %s758_s20 = smov [#allocation5]   ;;  %s1124_s5 = int_to_ptr.vmem [resolvable:$true] %s513_s5 }
  0x88   : > { %s1122_s14 = scalar_lea.hbm %s1171_s1, %s613_s17  ;;  %s687_s19 = scalar_lea.vmem %s1124_s5, %s1111_s2 }
  0x89   : > { %p688_p9 = scmp.ne.s32.totalorder %s1124_s5, %s687_s19  ;;  %s691_s21 = sshll.u32 %s758_s20, 4  ;;  %s692_s21 = int_to_ptr.vmem [resolvable:$false] %s691_s21 }
  0x8a   : > { %s693_s10 = scalar_lea.vmem %s692_s21, 28672  ;;  %p694_p12 = scmp.lt.s32.totalorder %s1124_s5, %s692_s21 }
  0x8b   : > { %p689_p11 = pnand %p688_p9, %p599_p10  ;;  %p695_p0 = scmp.lt.s32.totalorder %s693_s10, %s687_s19 }
  0x8d   : > { %p690_p13 = pneg %p689_p11  ;;  %p696_p1 = por %p695_p0, %p694_p12 }
  0x8f   : > { %p697_p3 = pnand %p696_p1, %p690_p13 }
  0x91   : > { %700 = shalt.err (!%p697_p3)
}
  0x92   : > { %s701_s22 = scalar_lea.hbm %s1122_s14, %s1111_s2  ;;  %s705_s29 = scalar_lea.hbm %s1171_s1, 14848 }
  0x93   : > { %p702_p4 = scmp.ne.s32.totalorder %s1122_s14, %s701_s22  ;;  %p706_p7 = scmp.lt.u32.totalorder %s1122_s14, %s1171_s1 }
  0x94   : > { %p707_p8 = scmp.lt.u32.totalorder %s705_s29, %s701_s22  ;;  %p709_p9 = scmp.lt.u32.totalorder %s701_s22, %s1122_s14 }
  0x95   : > { %p703_p5 = pnand %p702_p4, %p599_p10 }
  0x96   : > { %p708_p6 = por %p707_p8, %p706_p7 }
  0x97   : > { %p704_p2 = pneg %p703_p5 }
  0x98   : > { %p710_p11 = por %p709_p9, %p708_p6 }
  0x9a   : > { %p711_p13 = pnand %p710_p11, %p704_p2 }
  0x9c   : > { %714 = shalt.err (!%p711_p13)
}
  0x9d   : > { %s759_s16 = smov 512   ;;  %s760_s25 = smov 32  }
  0x9e   : > { %519 = dma.vmem_to_hbm [thread:$0]  (%p599_p10), %s1124_s5, %s1111_s2, %s1122_s14, %s492_s23, %s759_s16, %s759_s16, %s760_s25  }
  0x9f PF: > { %s528_s28 = sand.u32 1, %s741_s6   ;;  %p1176_p12 = scmp.ne.s32.totalorder %s1175_s18, 0 }
  0xa0   : > { %p1177_p0 = scmp.ge.s32.totalorder %s753_s9, 2  ;;  %s529_s4 = scalar_lea.sflag [#allocation4], %s528_s28 }
  0xa2   : > { %p619_p1 = pnand %p1177_p0, %p1176_p12 }
  0xa4   : > { %736 = dma.done.wait (!%p619_p1), %s529_s4, 14336  }
  0xa5   : > { %738 = vsyncadd (!%p619_p1), %s529_s4, 4294952960  ;;  %p14_p3 = scmp.ge.s32.totalorder %s796_s12, 4   ;;  %s1178_s6 = smov %s745_s7 }
  0xa6   : > { %s1179_s7 = smov %s749_s8  ;;  %s1180_s8 = smov %s808_s15 }
  0xa7   : > { %s1181_s9 = smov %s796_s12  ;;  %16 = sbr.rel (!%p14_p3) target bundleno = 5 (0x5), region = 69 }
  0xae   :  { %534 = vsyncpa [#allocation3], 1 }
  0xaf   :  { %536 = vsyncpa [#allocation3 + $0x1], 1 }
  0xb0   :  { %537 = vsyncpa [#allocation4], 1 }
  0xb1   :  { %539 = vsyncpa [#allocation4 + $0x1], 1 }

</bundles_post_ra>
